<compile_context>
chip_gen: v7x
topology: tpu7x:2x2x1
jax: 0.10.0
libtpu: 0.0.40
codegen_flags: <defaults>
</compile_context>

<pallas_src>
import jax
import jax.numpy as jnp
import numpy as np
from jax.experimental import pallas as pl
from jax.experimental.pallas import tpu as pltpu

# ----------------------------- configuration --------------------------------
STATE_DIM = 12
NUM_TASKS = 4                      # also the number of heads (head_num)
HEAD_NUM = NUM_TASKS
HIDDEN = (32, 32)                  # cfg['hidden_shapes']
H = HIDDEN[0]                      # both hidden dims are 32
ACTION_DIM = 4
ORIGIN_OUT = 2 * ACTION_DIM        # origin_output_shape = 8
LAST_OUT = ORIGIN_OUT * HEAD_NUM   # output_shape of self.last = 32
IN_DIM = STATE_DIM + NUM_TASKS     # mtobs_dim = 16
BATCH = 8
LANES = 128

# -------------------------- weight-slab row layout ---------------------------
ROW_W1 = 0                        # rows   0..15 : [ws1 | wo1]           lanes 0:64
ROW_W23 = ROW_W1 + IN_DIM         # rows  16..79 : blockdiag(ws2,wo2)    lanes 0:64
                                  #                [[wc1,wlt],[0,wlb]]   lanes 64:128
ROW_GW = ROW_W23 + 2 * H          # rows  80..111: gsum_wide             lanes 0:128
ROW_W45 = ROW_GW + LAST_OUT       # rows 112..143: wc2 lanes 0:32, wc3 lanes 32:36
ROW_BIAS = ROW_W45 + H            # rows 144..148: fused bias rows + colgrp row
W_ROWS = ROW_BIAS + 8             # 152 rows total (multiple of 8)

# Static head-gather constants (pure data, built once on the host):
#   GSUM[j, a] = 1  iff  j // head_num == a     (group-sum matrix)
#   COLGRP[j]  = j % head_num                   (column group index, as float)
_GSUM = ((np.arange(LAST_OUT)[:, None] // HEAD_NUM)
         == np.arange(ORIGIN_OUT)[None, :]).astype(np.float32)          # (32, 8)
_COLGRP = (np.arange(LAST_OUT) % HEAD_NUM).astype(np.float32)[None, :]  # (1, 32)


# ------------------------------ Pallas kernel --------------------------------
def _bootstrapped_kernel(x_ref, idx_ref, w_ref, out_ref):
    x = x_ref[...]                                   # (B, 16)
    idxf = idx_ref[...]                              # (B, 1) head index as f32

    # ---- fused weight blocks (static sub-views of the single slab) ----------
    w1 = w_ref[ROW_W1:ROW_W1 + IN_DIM, 0:2 * H]          # (16, 64)
    w2 = w_ref[ROW_W23:ROW_W23 + 2 * H, 0:2 * H]         # (64, 64) blockdiag
    w3 = w_ref[ROW_W23:ROW_W23 + 2 * H, 2 * H:4 * H]     # (64, 64) [[wc1,wlt],[0,wlb]]
    gw = w_ref[ROW_GW:ROW_GW + LAST_OUT, :]              # (32, 128) gsum in lanes 0:8
    wc2 = w_ref[ROW_W45:ROW_W45 + H, 0:H]                # (32, 32)
    wc3 = w_ref[ROW_W45:ROW_W45 + H, H:H + NUM_TASKS]    # (32, 4)
    r = ROW_BIAS
    b1 = w_ref[r + 0:r + 1, 0:2 * H]                     # [bs1 | bo1]
    b2 = w_ref[r + 1:r + 2, 0:2 * H]                     # [bs2 | bo2]
    b3 = w_ref[r + 2:r + 3, 0:2 * H]                     # [bc1 | bl ]
    bc2 = w_ref[r + 3:r + 4, 0:H]
    bc3 = w_ref[r + 3:r + 4, H:H + NUM_TASKS]
    colg = w_ref[r + 4:r + 5, 0:LAST_OUT]                # (1, 32)

    relu = lambda v: jnp.maximum(v, 0.0)
    dot = lambda a, b: jnp.dot(a, b, preferred_element_type=jnp.float32)

    # D1/D2: both feature towers in one fused matmul each (MLPBase: ReLU all layers)
    a1 = relu(dot(x, w1) + b1)                           # (B, 64) = [hs1 | ho1]
    a2 = relu(dot(a1, w2) + b2)                          # (B, 64) = [hs2 | ho2]

    # D3: classifier layer-1 pre-act AND the `last` projection in one matmul:
    #   lanes 0:32  = hs2 @ wc1 + bc1          (needs ReLU)
    #   lanes 32:64 = hs2 @ wlt + ho2 @ wlb + bl   (== concat([hs2,ho2]) @ wl + bl)
    a3 = dot(a2, w3) + b3                                # (B, 64)
    c1 = relu(a3[:, 0:H])                                # (B, 32)
    full = a3[:, H:2 * H]                                # (B, 32)

    # classifier tail (gradient reversal is identity in forward)
    c2 = relu(dot(c1, wc2) + bc2)                        # (B, 32)
    logits = dot(c2, wc3) + bc3                          # (B, 4)
    m = jnp.max(logits, axis=1, keepdims=True)
    e = jnp.exp(logits - m)
    task = e * pl.reciprocal(jnp.sum(e, axis=1, keepdims=True), approx=True)

    # head gather: out[b, a] = full[b, a*head_num + idx[b]]
    # mask + group-sum matmul; gsum is pre-widened to 128 lanes so the result
    # IS the lane-dense output slab (head_out in lanes 0:8, zeros elsewhere).
    masked = jnp.where(colg == idxf, full, 0.0)          # (B, 32)
    slab = dot(masked, gw)                               # (B, 128)

    out_ref[...] = slab                                  # single full-width store
    out_ref[:, ORIGIN_OUT:ORIGIN_OUT + NUM_TASKS] = task # small masked store


# ------------------------------ packing helpers ------------------------------
def pack_weight_slab(params):
    """Pre-pack all weights/biases + static gather constants into one slab."""
    (ws1, bs1, ws2, bs2,
     wo1, bo1, wo2, bo2,
     wc1, bc1, wc2, bc2, wc3, bc3,
     wl, bl) = params
    s = jnp.zeros((W_ROWS, LANES), jnp.float32)
    # D1: [ws1 | wo1]
    s = s.at[ROW_W1:ROW_W1 + IN_DIM, 0:H].set(ws1)
    s = s.at[ROW_W1:ROW_W1 + IN_DIM, H:2 * H].set(wo1)
    # D2: blockdiag(ws2, wo2)            (lanes 0:64)
    s = s.at[ROW_W23:ROW_W23 + H, 0:H].set(ws2)
    s = s.at[ROW_W23 + H:ROW_W23 + 2 * H, H:2 * H].set(wo2)
    # D3: [[wc1, wlt],[0, wlb]]          (lanes 64:128)
    s = s.at[ROW_W23:ROW_W23 + H, 2 * H:3 * H].set(wc1)
    s = s.at[ROW_W23:ROW_W23 + H, 3 * H:4 * H].set(wl[:H, :])        # wl top half
    s = s.at[ROW_W23 + H:ROW_W23 + 2 * H, 3 * H:4 * H].set(wl[H:, :])  # wl bottom half
    # D5a: group-sum matrix widened to 128 output lanes (head_out -> lanes 0:8)
    s = s.at[ROW_GW:ROW_GW + LAST_OUT, 0:ORIGIN_OUT].set(_GSUM)
    # D4 / D5b: wc2 and wc3
    s = s.at[ROW_W45:ROW_W45 + H, 0:H].set(wc2)
    s = s.at[ROW_W45:ROW_W45 + H, H:H + NUM_TASKS].set(wc3)
    # fused bias rows + colgrp constant
    r = ROW_BIAS
    s = s.at[r + 0:r + 1, 0:H].set(bs1)
    s = s.at[r + 0:r + 1, H:2 * H].set(bo1)
    s = s.at[r + 1:r + 2, 0:H].set(bs2)
    s = s.at[r + 1:r + 2, H:2 * H].set(bo2)
    s = s.at[r + 2:r + 3, 0:H].set(bc1)
    s = s.at[r + 2:r + 3, H:2 * H].set(bl)
    s = s.at[r + 3:r + 4, 0:H].set(bc2)
    s = s.at[r + 3:r + 4, H:H + NUM_TASKS].set(bc3)
    s = s.at[r + 4:r + 5, 0:LAST_OUT].set(_COLGRP)
    return s


# ------------------------------ wrapper --------------------------------------
@jax.jit
def bootstrapped_net_forward(x, idx, weight_slab):
    B = x.shape[0]
    # No (B,128) repack: pass x and idx directly (two tiny input DMAs).
    idxf = idx.astype(jnp.float32)[:, None]               # (B, 1)

    packed = pl.pallas_call(
        _bootstrapped_kernel,
        out_shape=jax.ShapeDtypeStruct((B, LANES), jnp.float32),
        in_specs=[pl.BlockSpec(memory_space=pltpu.MemorySpace.VMEM),
                  pl.BlockSpec(memory_space=pltpu.MemorySpace.VMEM),
                  pl.BlockSpec(memory_space=pltpu.MemorySpace.VMEM)],
        out_specs=pl.BlockSpec(memory_space=pltpu.MemorySpace.VMEM),
    )(x, idxf, weight_slab)

    out = packed[:, 0:ORIGIN_OUT]
    task = packed[:, ORIGIN_OUT:ORIGIN_OUT + NUM_TASKS]
    return out, task
# TODO(synk): at real batch sizes, add a grid over B with
# dimension_semantics=("parallel",), block_B >= 256, and a grid-invariant
# weight-slab BlockSpec (index_map -> (0, 0)) so the work shards across the
# two v7x TensorCores and the slab is DMA'd once; do NOT split B=8.


# --------------------------- deterministic params ----------------------------
def make_params(key):
    ks = jax.random.split(key, 18)
    s = 0.1

    def w(k, shape):
        return jax.random.normal(k, shape, jnp.float32) * s

    def b(k, dim):
        return jax.random.normal(k, (1, dim), jnp.float32) * s

    h1, h2 = HIDDEN
    params = (
        # feature_share
        w(ks[0], (IN_DIM, h1)), b(ks[1], h1),
        w(ks[2], (h1, h2)),     b(ks[3], h2),
        # feature_own
        w(ks[4], (IN_DIM, h1)), b(ks[5], h1),
        w(ks[6], (h1, h2)),     b(ks[7], h2),
        # classifier (build_mlp: Linear+ReLU, Linear+ReLU, Linear)
        w(ks[8], (h2, h1)),     b(ks[9], h1),
        w(ks[10], (h1, h2)),    b(ks[11], h2),
        w(ks[12], (h2, NUM_TASKS)), b(ks[13], NUM_TASKS),
        # last
        w(ks[14], (2 * h2, LAST_OUT)), b(ks[15], LAST_OUT),
    )
    return params


# ------------------------------ pure-JAX reference ---------------------------
def reference_forward(x, idx, p):
    (ws1, bs1, ws2, bs2,
     wo1, bo1, wo2, bo2,
     wc1, bc1, wc2, bc2, wc3, bc3,
     wl, bl) = p
    relu = lambda v: jnp.maximum(v, 0.0)
    hs = relu(x @ ws1 + bs1)
    hs = relu(hs @ ws2 + bs2)
    ho = relu(x @ wo1 + bo1)
    ho = relu(ho @ wo2 + bo2)
    c = relu(hs @ wc1 + bc1)
    c = relu(c @ wc2 + bc2)
    task = jax.nn.softmax(c @ wc3 + bc3, axis=1)
    feat = jnp.concatenate([hs, ho], axis=1)
    full = feat @ wl + bl
    full3 = full.reshape(x.shape[0], ORIGIN_OUT, HEAD_NUM)
    out = jnp.take_along_axis(full3, idx[:, None, None].astype(jnp.int32),
                              axis=-1)[..., 0]
    return out, task


# ----------------------------------- main -------------------------------------
if __name__ == "__main__":
    key = jax.random.PRNGKey(0)
    k_x, k_idx, k_p = jax.random.split(key, 3)

    x = jax.random.normal(k_x, (BATCH, IN_DIM), jnp.float32)
    idx = jax.random.randint(k_idx, (BATCH,), 0, HEAD_NUM, jnp.int32)
    params = make_params(k_p)
    weight_slab = pack_weight_slab(params)   # pre-packed once, reused per call

    out, task = bootstrapped_net_forward(x, idx, weight_slab)
    out = jax.block_until_ready(out)
    task = jax.block_until_ready(task)

    ref_out, ref_task = reference_forward(x, idx, params)
    np.testing.assert_allclose(np.asarray(out), np.asarray(ref_out),
                               rtol=1e-5, atol=1e-5)
    # task uses pl.reciprocal(approx=True) (EUP) -> slightly looser tolerance
    np.testing.assert_allclose(np.asarray(task), np.asarray(ref_task),
                               rtol=2e-3, atol=2e-3)

    assert out.shape == (BATCH, ORIGIN_OUT)
    assert task.shape == (BATCH, NUM_TASKS)
    print("KERNEL_OK")
</pallas_src>

<mosaic_0001>
module attributes {stable_mosaic.version = 11 : i64} {
  func.func @_bootstrapped_kernel(%arg0: memref<8x16xf32, #tpu.memory_space<vmem>>, %arg1: memref<8x1xf32, #tpu.memory_space<vmem>>, %arg2: memref<152x128xf32, #tpu.memory_space<vmem>>, %arg3: memref<8x128xf32, #tpu.memory_space<vmem>>) attributes {dimension_semantics = [], scalar_prefetch = 0 : i64, scratch_operands = 0 : i64, tpu.core_type = #tpu.core_type<tc>} {
    %c0 = arith.constant 0 : index
    %c0_0 = arith.constant 0 : index
    %0 = vector.load %arg0[%c0, %c0_0] : memref<8x16xf32, #tpu.memory_space<vmem>>, vector<8x16xf32>
    %c0_1 = arith.constant 0 : index
    %c0_2 = arith.constant 0 : index
    %1 = vector.load %arg1[%c0_1, %c0_2] : memref<8x1xf32, #tpu.memory_space<vmem>>, vector<8x1xf32>
    %c0_3 = arith.constant 0 : index
    %c0_4 = arith.constant 0 : index
    %2 = vector.load %arg2[%c0_3, %c0_4] : memref<152x128xf32, #tpu.memory_space<vmem>>, vector<16x64xf32>
    %c16 = arith.constant 16 : index
    %c0_5 = arith.constant 0 : index
    %3 = vector.load %arg2[%c16, %c0_5] : memref<152x128xf32, #tpu.memory_space<vmem>>, vector<64x64xf32>
    %c16_6 = arith.constant 16 : index
    %c64 = arith.constant 64 : index
    %4 = vector.load %arg2[%c16_6, %c64] : memref<152x128xf32, #tpu.memory_space<vmem>>, vector<64x64xf32>
    %c80 = arith.constant 80 : index
    %c0_7 = arith.constant 0 : index
    %5 = vector.load %arg2[%c80, %c0_7] : memref<152x128xf32, #tpu.memory_space<vmem>>, vector<32x128xf32>
    %c112 = arith.constant 112 : index
    %c0_8 = arith.constant 0 : index
    %6 = vector.load %arg2[%c112, %c0_8] : memref<152x128xf32, #tpu.memory_space<vmem>>, vector<32x32xf32>
    %c112_9 = arith.constant 112 : index
    %c32 = arith.constant 32 : index
    %7 = vector.load %arg2[%c112_9, %c32] : memref<152x128xf32, #tpu.memory_space<vmem>>, vector<32x4xf32>
    %c144 = arith.constant 144 : index
    %c0_10 = arith.constant 0 : index
    %8 = vector.load %arg2[%c144, %c0_10] : memref<152x128xf32, #tpu.memory_space<vmem>>, vector<1x64xf32>
    %c145 = arith.constant 145 : index
    %c0_11 = arith.constant 0 : index
    %9 = vector.load %arg2[%c145, %c0_11] : memref<152x128xf32, #tpu.memory_space<vmem>>, vector<1x64xf32>
    %c146 = arith.constant 146 : index
    %c0_12 = arith.constant 0 : index
    %10 = vector.load %arg2[%c146, %c0_12] : memref<152x128xf32, #tpu.memory_space<vmem>>, vector<1x64xf32>
    %c147 = arith.constant 147 : index
    %c0_13 = arith.constant 0 : index
    %11 = vector.load %arg2[%c147, %c0_13] : memref<152x128xf32, #tpu.memory_space<vmem>>, vector<1x32xf32>
    %c147_14 = arith.constant 147 : index
    %c32_15 = arith.constant 32 : index
    %12 = vector.load %arg2[%c147_14, %c32_15] : memref<152x128xf32, #tpu.memory_space<vmem>>, vector<1x4xf32>
    %c148 = arith.constant 148 : index
    %c0_16 = arith.constant 0 : index
    %13 = vector.load %arg2[%c148, %c0_16] : memref<152x128xf32, #tpu.memory_space<vmem>>, vector<1x32xf32>
    %cst = arith.constant dense<0.000000e+00> : vector<8x64xf32>
    %14 = tpu.matmul %0, %2, %cst {dimension_numbers = #tpu.dot_dimension_numbers<[1], [0], [0], [1], [0, 0, 1, 1], [], []>} : vector<8x16xf32>, vector<16x64xf32>, vector<8x64xf32> -> vector<8x64xf32>
    %15 = vector.broadcast %8 : vector<1x64xf32> to vector<8x64xf32>
    %16 = arith.addf %14, %15 : vector<8x64xf32>
    %cst_17 = arith.constant 0.000000e+00 : f32
    %17 = vector.broadcast %cst_17 : f32 to vector<8x64xf32>
    %18 = arith.maximumf %16, %17 : vector<8x64xf32>
    %cst_18 = arith.constant dense<0.000000e+00> : vector<8x64xf32>
    %19 = tpu.matmul %18, %3, %cst_18 {dimension_numbers = #tpu.dot_dimension_numbers<[1], [0], [0], [1], [0, 0, 1, 1], [], []>} : vector<8x64xf32>, vector<64x64xf32>, vector<8x64xf32> -> vector<8x64xf32>
    %20 = vector.broadcast %9 : vector<1x64xf32> to vector<8x64xf32>
    %21 = arith.addf %19, %20 : vector<8x64xf32>
    %cst_19 = arith.constant 0.000000e+00 : f32
    %22 = vector.broadcast %cst_19 : f32 to vector<8x64xf32>
    %23 = arith.maximumf %21, %22 : vector<8x64xf32>
    %cst_20 = arith.constant dense<0.000000e+00> : vector<8x64xf32>
    %24 = tpu.matmul %23, %4, %cst_20 {dimension_numbers = #tpu.dot_dimension_numbers<[1], [0], [0], [1], [0, 0, 1, 1], [], []>} : vector<8x64xf32>, vector<64x64xf32>, vector<8x64xf32> -> vector<8x64xf32>
    %25 = vector.broadcast %10 : vector<1x64xf32> to vector<8x64xf32>
    %26 = arith.addf %24, %25 : vector<8x64xf32>
    %27 = vector.extract_strided_slice %26 {offsets = [0, 0], sizes = [8, 32], strides = [1, 1]} : vector<8x64xf32> to vector<8x32xf32>
    %cst_21 = arith.constant 0.000000e+00 : f32
    %28 = vector.broadcast %cst_21 : f32 to vector<8x32xf32>
    %29 = arith.maximumf %27, %28 : vector<8x32xf32>
    %30 = vector.extract_strided_slice %26 {offsets = [0, 32], sizes = [8, 32], strides = [1, 1]} : vector<8x64xf32> to vector<8x32xf32>
    %cst_22 = arith.constant dense<0.000000e+00> : vector<8x32xf32>
    %31 = tpu.matmul %29, %6, %cst_22 {dimension_numbers = #tpu.dot_dimension_numbers<[1], [0], [0], [1], [0, 0, 1, 1], [], []>} : vector<8x32xf32>, vector<32x32xf32>, vector<8x32xf32> -> vector<8x32xf32>
    %32 = vector.broadcast %11 : vector<1x32xf32> to vector<8x32xf32>
    %33 = arith.addf %31, %32 : vector<8x32xf32>
    %cst_23 = arith.constant 0.000000e+00 : f32
    %34 = vector.broadcast %cst_23 : f32 to vector<8x32xf32>
    %35 = arith.maximumf %33, %34 : vector<8x32xf32>
    %cst_24 = arith.constant dense<0.000000e+00> : vector<8x4xf32>
    %36 = tpu.matmul %35, %7, %cst_24 {dimension_numbers = #tpu.dot_dimension_numbers<[1], [0], [0], [1], [0, 0, 1, 1], [], []>} : vector<8x32xf32>, vector<32x4xf32>, vector<8x4xf32> -> vector<8x4xf32>
    %37 = vector.broadcast %12 : vector<1x4xf32> to vector<8x4xf32>
    %38 = arith.addf %36, %37 : vector<8x4xf32>
    %cst_25 = arith.constant dense<0xFF800000> : vector<8xf32>
    %39 = vector.multi_reduction <maximumf>, %38, %cst_25 [1] : vector<8x4xf32> to vector<8xf32>
    %40 = vector.shape_cast %39 : vector<8xf32> to vector<8x1xf32>
    %41 = vector.broadcast %40 : vector<8x1xf32> to vector<8x4xf32>
    %42 = arith.subf %38, %41 : vector<8x4xf32>
    %43 = math.exp %42 : vector<8x4xf32>
    %cst_26 = arith.constant dense<0.000000e+00> : vector<8xf32>
    %44 = vector.multi_reduction <add>, %43, %cst_26 [1] : vector<8x4xf32> to vector<8xf32>
    %45 = vector.shape_cast %44 : vector<8xf32> to vector<8x1xf32>
    %46 = tpu.reciprocal %45 {approx = true} : vector<8x1xf32> -> vector<8x1xf32>
    %47 = vector.broadcast %46 : vector<8x1xf32> to vector<8x4xf32>
    %48 = arith.mulf %43, %47 : vector<8x4xf32>
    %49 = vector.broadcast %13 : vector<1x32xf32> to vector<8x32xf32>
    %50 = vector.broadcast %1 : vector<8x1xf32> to vector<8x32xf32>
    %51 = arith.cmpf oeq, %49, %50 : vector<8x32xf32>
    %cst_27 = arith.constant 0.000000e+00 : f32
    %52 = vector.broadcast %cst_27 : f32 to vector<8x32xf32>
    %53 = arith.select %51, %30, %52 : vector<8x32xi1>, vector<8x32xf32>
    %cst_28 = arith.constant dense<0.000000e+00> : vector<8x128xf32>
    %54 = tpu.matmul %53, %5, %cst_28 {dimension_numbers = #tpu.dot_dimension_numbers<[1], [0], [0], [1], [0, 0, 1, 1], [], []>} : vector<8x32xf32>, vector<32x128xf32>, vector<8x128xf32> -> vector<8x128xf32>
    %c0_29 = arith.constant 0 : index
    %c0_30 = arith.constant 0 : index
    %55 = vector.load %arg3[%c0_29, %c0_30] : memref<8x128xf32, #tpu.memory_space<vmem>>, vector<8x128xf32>
    tpu.vector_store %arg3[%c0_29, %c0_30], %54 {strides = array<i32>} : memref<8x128xf32, #tpu.memory_space<vmem>>, vector<8x128xf32>,
    %c0_31 = arith.constant 0 : index
    %c8 = arith.constant 8 : index
    %56 = vector.load %arg3[%c0_31, %c8] : memref<8x128xf32, #tpu.memory_space<vmem>>, vector<8x4xf32>
    tpu.vector_store %arg3[%c0_31, %c8], %48 {strides = array<i32>} : memref<8x128xf32, #tpu.memory_space<vmem>>, vector<8x4xf32>,
    return
  }
}

</mosaic_0001>

<bundles_post_ra>
// kernel: bootstrapped_net_forward.1
= control target key start
LH: loop header
LB: loop body
LE: loop exit
PB: predicated region body
PF: predicated region fallthrough
CT: control target
= control target key end

     0   :  { %8 = vsyncpa [#allocation3], 0  ;;  %s844_s12 = smov [#allocation2]   ;;  %s935_s0 = inlined_call_operand.vmem [shape: f32[8,16], index: 0, kind: input, shape index: {}]   ;;  %s936_s1 = inlined_call_operand.vmem [shape: f32[8,1], index: 1, kind: input, shape index: {}]   ;;  %s937_s2 = inlined_call_operand.hbm [shape: f32[152,128], index: 2, kind: input, shape index: {}]   ;;  %s938_s3 = inlined_call_operand.vmem [shape: f32[8,128], index: 3, kind: output, shape index: {}]  }
   0x1   :  { %s18_s13 = sshll.u32 %s844_s12, 4  ;;  %s820_s16 = scalar_lea.hbm %s937_s2, 2432  ;;  %s19_s13 = int_to_ptr.vmem [resolvable:$true] %s18_s13 }
   0x2   :  { %p821_p0 = scmp.ne.s32.totalorder %s937_s2, %s820_s16  ;;  %p824_p1 = scmp.lt.u32.totalorder %s820_s16, %s937_s2 }
   0x4   :  { %p826_p2 = pnand %p824_p1, %p821_p0 }
   0x6   :  { %829 = shalt.err (!%p826_p2)
}
   0x7   :  { %s830_s21 = scalar_lea.vmem %s19_s13, 2432  ;;  %p835_p4 = scmp.lt.s32.totalorder %s19_s13, %s19_s13 }
   0x8   :  { %p831_p3 = scmp.ne.s32.totalorder %s19_s13, %s830_s21  ;;  %p836_p5 = scmp.lt.s32.totalorder %s830_s21, %s830_s21 }
   0xa   :  { %p837_p6 = por %p836_p5, %p835_p4 }
   0xc   :  { %p838_p7 = pnand %p837_p6, %p831_p3 }
   0xe   :  { %841 = shalt.err (!%p838_p7)
}
   0xf   :  { %s845_s22 = smov 128   ;;  %s846_s23 = smov 8  }
  0x10   :  { %24 = dma.hbm_to_vmem [thread:$0]  %s937_s2, 2432, %s19_s13, [#allocation3], %s845_s22, %s845_s22, %s846_s23  }
  0x11   :  { %842 = dma.done.wait [#allocation3], 2432  }
  0x12   :  { %843 = vsyncadd [#allocation3], 4294964864  ;;  %v847_v0 = vmov 0.0|0.0   ;;  %vm848_vm0 = vmmov 0   ;;  %v849_v1 = vmov 0.0   ;;  %v30_v2 = vld [vmem:[#allocation2] sm:$0xff] }
  0x13   :  { %730 = vmatprep.subr.bf16.mxu0 %v847_v0  ;;  %656 = vmatprep.mubr.msk.f32.mxu0 %vm848_vm0, %v849_v1  ;;  %v31_v3 = vld [vmem:[#allocation2 + $0x8] sm:$0xff]  ;;  %v32_v5 = vld [vmem:[#allocation2 + $0x10] sm:$0xff]  ;;  %v33_v6 = vld [vmem:[#allocation2 + $0x18] sm:$0xff]  ;;  %vm57_vm1 = vcmask 130048   ;;  %vm136_vm2 = vcmask 523264   ;;  %v851_v46 = vmov 0  }
  0x14   :  { %733 = vmatprep.subr.bf16.mxu1 %v847_v0  ;;  %675 = vmatprep.mubr.msk.f32.mxu1 %vm848_vm0, %v849_v1  ;;  %v731_v4 = vpack.c.bf16 %v31_v3, %v30_v2  ;;  %v34_v7 = vld [vmem:[#allocation2 + $0x20] sm:$0xff]  ;;  %v734_v8 = vpack.c.bf16 %v33_v6, %v32_v5  ;;  %v35_v9 = vld [vmem:[#allocation2 + $0x28] sm:$0xff]  ;;  %v36_v12 = vld [vmem:[#allocation2 + $0x30] sm:$0xff]  ;;  %v784_v18 = vpack.i.bf16 %v33_v6, %v32_v5  ;;  %s852_s27 = smov 96   ;;  %vm325_vm3 = vcmask 261120  }
  0x15   :  { %v28_v10 = vld [vmem:[%s935_s0] sm:$0xff]  ;;  %v737_v11 = vpack.c.bf16 %v35_v9, %v34_v7  ;;  %v37_v13 = vld [vmem:[#allocation2 + $0x38] sm:$0xff]  ;;  %v39_v16 = vld [vmem:[#allocation2 + $0x48] sm:$0xff]  ;;  %s850_s0 = smov 64   ;;  %v789_v20 = vpack.i.bf16 %v35_v9, %v34_v7  ;;  %814 = vset.pattern.permute.xlu1 %v851_v46  ;;  %815 = vset.pattern.permute.xlu0 %v851_v46  ;;  %vm493_vm5 = vcmask 31744   ;;  %vm598_vm6 = vcmask 97344  }
  0x16   :  { %732 = vmatpush3.bf16.msra.mxu0 %v731_v4  ;;  %735 = vmatpush3.bf16.msra.mxu1 %v734_v8  ;;  %v740_v14 = vpack.c.bf16 %v37_v13, %v36_v12  ;;  %v38_v15 = vld [vmem:[#allocation2 + $0x40] sm:$0xff]  ;;  %v794_v19 = vpack.i.bf16 %v37_v13, %v36_v12  ;;  %v605_v28 = vld [vmem:[#allocation2 + $0x90] ss:$0 sm:$0xff]  ;;  %v47_v44 = vld [vmem:[#allocation2 + $0x88] sm:$0xff] }
  0x17   :  { %745 = vmatprep.subr.bf16.mxu0 %v847_v0  ;;  %736 = vmatprep.subr.bf16.mxu1 %v847_v0  ;;  %v743_v17 = vpack.c.bf16 %v39_v16, %v38_v15  ;;  %v799_v21 = vpack.i.bf16 %v39_v16, %v38_v15  ;;  %v46_v43 = vld [vmem:[#allocation2 + $0x80] sm:$0xff]  ;;  %v44_v47 = vld [vmem:[#allocation2 + $0x70] sm:$0xff]  ;;  %v45_v48 = vld [vmem:[#allocation2 + $0x78] sm:$0xff] }
  0x18   :  { %785 = vrot.lane.b32.xlu0 %v784_v18, %s850_s0  ;;  %795 = vrot.lane.b32.xlu1 %v794_v19, %s850_s0  ;;  %v809_v45 = vpack.i.bf16 %v47_v44, %v46_v43  ;;  %v804_v49 = vpack.i.bf16 %v45_v48, %v44_v47  ;;  %v758_v50 = vpack.c.bf16 %v45_v48, %v44_v47  ;;  %v29_v52 = vld [vmem:[%s936_s1] sm:$0xff]  ;;  %v611_v53 = vld [vmem:[#allocation2 + $0x93] ss:$0 sm:$0xff]  ;;  %v607_v54 = vld [vmem:[#allocation2 + $0x91] ss:$0 sm:$0xff] }
  0x19   :  { %657 = vmatmul.mubr.msk.f32.vlgmr.msra.gmra.mrb[0].mxu0 %vm57_vm1, %v28_v10  ;;  %v761_v51 = vpack.c.bf16 %v47_v44, %v46_v43  ;;  %v609_v5 = vld [vmem:[#allocation2 + $0x92] ss:$0 sm:$0xff]  ;;  %v41_v7 = vld [vmem:[#allocation2 + $0x58] sm:$0xff]  ;;  %v42_v13 = vld [vmem:[#allocation2 + $0x60] sm:$0xff] }
  0x1a   :  { %694 = vmatprep.mubr.msk.f32.mxu0 %vm848_vm0, %v849_v1  ;;  %738 = vmatpush3.bf16.msra.mxu1 %v737_v11  ;;  %v40_v6 = vld [vmem:[#allocation2 + $0x50] sm:$0xff] }
  0x1b   :  { %739 = vmatprep.subr.bf16.mxu1 %v847_v0  ;;  %v770_v11 = vpack.c.bf16 %v41_v7, %v40_v6 }
  0x1c   :  { %790 = vrot.lane.b32.xlu0 %v789_v20, %s850_s0  ;;  %800 = vrot.lane.b32.xlu1 %v799_v21, %s850_s0 }
  0x1e   :  { %741 = vmatpush3.bf16.msra.mxu1 %v740_v14  ;;  %v43_v14 = vld [vmem:[#allocation2 + $0x68] sm:$0xff] }
  0x1f   :  { %742 = vmatprep.subr.bf16.mxu1 %v847_v0  ;;  %v773_v15 = vpack.c.bf16 %v43_v14, %v42_v13 }
  0x20   :  { %810 = vrot.lane.b32.xlu1 %v809_v45, %s852_s27  ;;  %805 = vrot.lane.b32.xlu0 %v804_v49, %s852_s27 }
  0x22   :  { %744 = vmatpush3.bf16.msra.mxu1 %v743_v17  ;;  %v614_v17 = vld [vmem:[#allocation2 + $0x94] ss:$0 sm:$0xff] }
  0x23   :  { %757 = vmatprep.subr.bf16.mxu1 %v847_v0 }
  0x24   :  { %511 = vperm.xlu1 %814, %v29_v52   ;;  %417 = vrot.lane.b32.xlu0 %v611_v53, %s852_s27 }
  0x8a   :  { %v786_v22 = vpop.permute.xlu0 %785  ;;  %v796_v23 = vpop.permute.xlu1 %795 }
  0x8b   :  { %v788_v24 = vunpack.i.h.bf16 %v786_v22  ;;  %v787_v25 = vunpack.i.l.bf16 %v786_v22  ;;  %v798_v31 = vunpack.i.h.bf16 %v796_v23  ;;  %v797_v32 = vunpack.i.l.bf16 %v796_v23 }
  0x8d   :  { %v746_v26 = vpack.c.bf16 %v788_v24, %v787_v25  ;;  %v752_v38 = vpack.c.bf16 %v798_v31, %v797_v32 }
  0x8e   :  { %v791_v27 = vpop.permute.xlu0 %790  ;;  %v801_v33 = vpop.permute.xlu1 %800 }
  0x8f   :  { %v793_v29 = vunpack.i.h.bf16 %v791_v27  ;;  %v792_v30 = vunpack.i.l.bf16 %v791_v27  ;;  %747 = vmatpush3.bf16.msra.mxu0 %v746_v26  ;;  %v803_v39 = vunpack.i.h.bf16 %v801_v33  ;;  %v802_v40 = vunpack.i.l.bf16 %v801_v33 }
  0x90   :  { %748 = vmatprep.subr.bf16.mxu0 %v847_v0 }
  0x91   :  { %v749_v35 = vpack.c.bf16 %v793_v29, %v792_v30  ;;  %v755_v42 = vpack.c.bf16 %v803_v39, %v802_v40 }
  0x92   :  { %v806_v59 = vpop.permute.xlu0 %805  ;;  %v811_v60 = vpop.permute.xlu1 %810 }
  0x93   :  { %750 = vmatpush3.bf16.msra.mxu0 %v749_v35  ;;  %v808_v61 = vunpack.i.h.bf16 %v806_v59  ;;  %v807_v62 = vunpack.i.l.bf16 %v806_v59  ;;  %v813_v63 = vunpack.i.h.bf16 %v811_v60  ;;  %v812_v2 = vunpack.i.l.bf16 %v811_v60 }
  0x94   :  { %751 = vmatprep.subr.bf16.mxu0 %v847_v0 }
  0x95   :  { %v764_v3 = vpack.c.bf16 %v808_v61, %v807_v62  ;;  %v767_v4 = vpack.c.bf16 %v813_v63, %v812_v2 }
  0x96   :  { %v418_v16 = vpop.permute.xlu0 %417 }
  0x97   :  { %753 = vmatpush3.bf16.msra.mxu0 %v752_v38 }
  0x98   :  { %754 = vmatprep.subr.bf16.mxu0 %v847_v0 }
  0x9b   :  { %756 = vmatpush3.bf16.msra.mxu0 %v755_v42 }
  0x9c   :  { %763 = vmatprep.subr.bf16.mxu0 %v847_v0 }
  0xa3   :  { %v512_v18 = vpop.permute.xlu1 %511 }
  0xa4   :  { %vm514_vm4 = vcmp.eq.f32.partialorder %v614_v17, %v512_v18 }
  0xec   :  { %v127_v34 = vpop.f32.mrb[0].mxu0 }
  0xed   :  { %v128_v36 = vadd.f32 %v605_v28, %v127_v34  ;;  %v658_v37 = vpop.f32.mrb[1].mxu0 }
  0xef   :  { %v131_v41 = vmax.f32 %v128_v36, 0.0 }
  0xf1   :  { %676 = vmatmul.mubr.msk.f32.vlgmr.msra.gmra.mrb[0].mxu1 %vm136_vm2, %v131_v41 }
  0xf2   :  { %705 = vmatprep.mubr.msk.f32.mxu1 %vm848_vm0, %v849_v1  ;;  %759 = vmatpush3.bf16.msra.mxu1 %v758_v50 }
  0xf3   :  { %760 = vmatprep.subr.bf16.mxu1 %v847_v0 }
  0xf6   :  { %762 = vmatpush3.bf16.msra.mxu1 %v761_v51 }
  0xf7   :  { %769 = vmatprep.subr.bf16.mxu1 %v847_v0 }
 0x1c4   :  { %v206_v55 = vpop.f32.mrb[0].mxu1 }
 0x1c5   :  { %v207_v56 = vadd.f32 %v607_v54, %v206_v55  ;;  %v677_v57 = vpop.f32.mrb[1].mxu1 }
 0x1c7   :  { %v210_v58 = vmax.f32 %v207_v56, 0.0 }
 0x1c9   :  { %695 = vmatmul.mubr.msk.f32.vlgmr.msra.gmra.mrb[2].mxu0 %vm136_vm2, %v210_v58 }
 0x1ca   :  { %716 = vmatprep.mubr.msk.f32.mxu0 %vm848_vm0, %v849_v1  ;;  %765 = vmatpush3.bf16.msra.mxu0 %v764_v3 }
 0x1cb   :  { %766 = vmatprep.subr.bf16.mxu0 %v847_v0 }
 0x1ce   :  { %768 = vmatpush3.bf16.msra.mxu0 %v767_v4 }
 0x29c   :  { %v316_v8 = vpop.f32.mrb[2].mxu0 }
 0x29d   :  { %v317_v9 = vadd.f32 %v609_v5, %v316_v8  ;;  %v696_v10 = vpop.f32.mrb[3].mxu0 }
 0x29f   :  { %v320_v12 = vmax.f32 %v317_v9, 0.0  ;;  %516 = vrot.lane.b32.xlu0 %v317_v9, %s852_s27 }
 0x2a1   :  { %706 = vmatmul.mubr.msk.f32.vlgmr.msra.gmra.mrb[2].mxu1 %vm325_vm3, %v320_v12 }
 0x2a2   :  { %771 = vmatpush3.bf16.msra.mxu1 %v770_v11  ;;  %727 = vmatprep.mubr.msk.f32.mxu1 %vm848_vm0, %v849_v1 }
 0x2a3   :  { %772 = vmatprep.subr.bf16.mxu1 %v847_v0 }
 0x2a6   :  { %774 = vmatpush3.bf16.msra.mxu1 %v773_v15 }
 0x311   :  { %v517_v19 = vpop.permute.xlu0 %516 }
 0x312   :  { %v519_v20 = vsel %vm514_vm4, %v517_v19, 0.0 }
 0x313   :  { %728 = vmatmul.mubr.msk.f32.vlgmr.msra.gmra.mrb[4].mxu1 %vm325_vm3, %v519_v20 }
 0x374   :  { %v395_v21 = vpop.f32.mrb[2].mxu1 }
 0x375   :  { %v396_v22 = vadd.f32 %v611_v53, %v395_v21  ;;  %v707_v23 = vpop.f32.mrb[3].mxu1 }
 0x377   :  { %v399_v24 = vmax.f32 %v396_v22, 0.0 }
 0x379   :  { %717 = vmatmul.mubr.msk.f32.vlgmr.msra.gmra.mrb[4].mxu0 %vm325_vm3, %v399_v24 }
 0x3e6   :  { %v589_v25 = vpop.f32.mrb[4].mxu1 }
 0x3e7   :  { %593 = vst [vmem:[%s938_s3] sm:$0xff] %v589_v25  ;;  %v729_v0 = vpop.f32.mrb[5].mxu1 }
 0x44c   :  { %v489_v1 = vpop.f32.mrb[4].mxu0 }
 0x44d   :  { %v490_v26 = vadd.f32 %v489_v1, %v418_v16  ;;  %v718_v27 = vpop.f32.mrb[5].mxu0 }
 0x44f   :  { %v494_v28 = vsel %vm493_vm5, %v490_v26, -inf }
 0x450   :  { %495 = vmax.xlane.f32.xlu1 %v494_v28 }
 0x4dd   :  { %v496_v29 = vpop.xlane.xlu1 %495 }
 0x4de   :  { %v497_v30 = vsub.f32 %v490_v26, %v496_v29 }
 0x4e0   :  { %v498_v31 = vmul.f32 1.442695, %v497_v30 }
 0x4e2   :  { %816 = vpow2.f32 %v498_v31 }
 0x4ec   :  { %v817_v32 = vpop.eup %816 }
 0x4ed   :  { %v500_v33 = vsel %vm493_vm5, %v817_v32, 0.0 }
 0x4ee   :  { %501 = vadd.xlane.f32.xlu0 %v500_v33 }
 0x57b   :  { %v502_v34 = vpop.xlane.xlu0 %501 }
 0x57c   :  { %818 = vrcp.f32 %v502_v34 }
 0x586   :  { %v819_v35 = vpop.eup %818 }
 0x587   :  { %v504_v36 = vmul.f32 %v819_v35, %v817_v32 }
 0x589   :  { %595 = vrot.lane.b32.xlu0 %v504_v36, %s846_s23 }
 0x5fb   :  { %v596_v37 = vpop.permute.xlu0 %595 }
 0x5fc   :  { %599 = vst.msk [vmem:[%s938_s3] sm:$0xff] %vm598_vm6, %v596_v37 }
 0x5fd   :  { %604 = vsyncpa [#allocation3], 1 }

</bundles_post_ra>
